<compile_context>
chip_gen: v6e
topology: v6e:2x2x1
jax: 0.10.0
libtpu: 0.0.40
codegen_flags: <defaults>
</compile_context>

<pallas_src>
import jax
import jax.numpy as jnp
from jax.experimental import pallas as pl
from jax.experimental.pallas import tpu as pltpu


def _round_up(v: int, m: int) -> int:
    return ((v + m - 1) // m) * m


def _dist_linear_kernel(x_ref, w_ref, o_ref, acc_ref, xsq_ref, wsq_ref):
    k = pl.program_id(2)

    @pl.when(k == 0)
    def _init():
        acc_ref[...] = jnp.zeros_like(acc_ref)
        xsq_ref[...] = jnp.zeros_like(xsq_ref)
        wsq_ref[...] = jnp.zeros_like(wsq_ref)

    x = x_ref[...]                      # [tm, tk]  (input dtype, fed to MXU)
    w = w_ref[...]                      # [tn, tk]

    # Raw partial matmul on the MXU; contraction over the last dim of BOTH
    # operands, so W is consumed as [O, D] with no in-kernel transpose.
    acc_ref[...] += jax.lax.dot_general(
        x, w,
        dimension_numbers=(((1,), (1,)), ((), ())),
        preferred_element_type=jnp.float32,
    )

    xf = x.astype(jnp.float32)
    wf = w.astype(jnp.float32)

    # Per-row sum of squares of x: lane reduction -> [tm, 1] (sublane-major,
    # exactly the row-broadcast layout needed at finalize).
    xsq_ref[...] += jnp.sum(xf * xf, axis=1, keepdims=True)

    # Per-row sum of squares of W, laid out along lanes ([8, tn]) by reducing
    # with a ones-matmul on the MXU (avoids a VPU reduce + XLU transpose).
    # All 8 rows are identical; row 0 is used at finalize.
    ones = jnp.ones((8, wf.shape[1]), jnp.float32)
    wsq_ref[...] += jax.lax.dot_general(
        ones, wf * wf,
        dimension_numbers=(((1,), (1,)), ((), ())),
        preferred_element_type=jnp.float32,
    )

    @pl.when(k == pl.num_programs(2) - 1)
    def _finalize():
        # eps is added to the *norm* (not the squared norm), matching PyTorch.
        # approx=False keeps full f32 accuracy; the scale vectors are only
        # tm / tn elements, so the cost is negligible (flip to approx=True for
        # the EUP path if the tolerance budget allows).
        inv_x = pl.reciprocal(jnp.sqrt(xsq_ref[...]) + 1e-5,
                              approx=False)                       # [tm, 1]
        inv_w = pl.reciprocal(jnp.sqrt(wsq_ref[...][0:1, :]) + 1e-5,
                              approx=False)                       # [1, tn]
        o_ref[...] = (10.0 * acc_ref[...] * inv_x * inv_w).astype(o_ref.dtype)


def dist_linear(x, weight, *, tm=256, tn=512, tk=512):
    """x: [B, indim], weight: [outdim, indim] -> [B, outdim] (= 10 * cosine)."""
    B, D = x.shape
    O, D2 = weight.shape
    assert D == D2, "feature dims of x and weight must match"
    out_dtype = x.dtype

    # Clamp tiles for small problems while keeping (8, 128) block alignment.
    tm = min(tm, _round_up(B, 8))
    tn = min(tn, _round_up(O, 128))
    tk = min(tk, _round_up(D, 128))

    Bp, Op, Dp = _round_up(B, tm), _round_up(O, tn), _round_up(D, tk)

    # Lane-dense zero padding (exact: contributes 0 to dots and sum-squares).
    if (Bp, Dp) != (B, D):
        x = jnp.pad(x, ((0, Bp - B), (0, Dp - D)))
    if (Op, Dp) != (O, D):
        weight = jnp.pad(weight, ((0, Op - O), (0, Dp - D)))

    grid = (Bp // tm, Op // tn, Dp // tk)

    # Scoped-VMEM budget derived from the tiles: 2 buffers per input, 2 for the
    # output block, plus accumulator / norm scratch.  Floor at 32 MiB, cap at
    # 48 MiB so it stays under v7x's 64 MiB physical VMEM.
    itemsize = jnp.dtype(x.dtype).itemsize
    vmem_est = (2 * (tm * tk + tn * tk) * itemsize
                + 2 * tm * tn * jnp.dtype(out_dtype).itemsize
                + (tm * tn + tm * 128 + 8 * tn) * 4)
    vmem_limit = int(min(max(vmem_est + (8 << 20), 32 << 20), 48 << 20))

    out = pl.pallas_call(
        _dist_linear_kernel,
        out_shape=jax.ShapeDtypeStruct((Bp, Op), out_dtype),
        grid_spec=pltpu.PrefetchScalarGridSpec(
            num_scalar_prefetch=0,
            grid=grid,
            in_specs=[
                pl.BlockSpec((tm, tk), lambda i, j, k: (i, k)),   # x tile
                pl.BlockSpec((tn, tk), lambda i, j, k: (j, k)),   # W tile
            ],
            out_specs=pl.BlockSpec((tm, tn), lambda i, j, k: (i, j)),
            scratch_shapes=[
                pltpu.VMEM((tm, tn), jnp.float32),   # matmul accumulator
                pltpu.VMEM((tm, 1), jnp.float32),    # sum x^2 per batch row
                pltpu.VMEM((8, tn), jnp.float32),    # sum w^2 per output row (lane-major)
            ],
        ),
        compiler_params=pltpu.CompilerParams(
            dimension_semantics=("parallel", "parallel", "arbitrary"),
            vmem_limit_bytes=vmem_limit,
        ),
    )(x, weight)

    return out[:B, :O]


def dist_linear_ref(x, weight):
    x_n = x / (jnp.linalg.norm(x, axis=1, keepdims=True) + 1e-5)
    w_n = weight / (jnp.linalg.norm(weight, axis=1, keepdims=True) + 1e-5)
    return 10.0 * (x_n @ w_n.T)


if __name__ == "__main__":
    key = jax.random.PRNGKey(0)
    k_x, k_w, k_x2, k_w2 = jax.random.split(key, 4)

    # Small shapes consistent with the module (feature-vector classifier head).
    batch, indim, outdim = 8, 32, 16
    x = jax.random.normal(k_x, (batch, indim), dtype=jnp.float32)
    bound = 1.0 / (indim ** 0.5)   # nn.Linear default init range (deterministic here)
    weight = jax.random.uniform(
        k_w, (outdim, indim), dtype=jnp.float32, minval=-bound, maxval=bound
    )

    out = jax.block_until_ready(dist_linear(x, weight))
    ref = dist_linear_ref(x, weight)
    assert out.shape == (batch, outdim)
    assert jnp.allclose(out, ref, atol=1e-4, rtol=1e-4), "mismatch vs reference (small)"

    # Second check: exercises a multi-tile grid (i, j, k all > 1) plus padding
    # of batch / outdim and a multi-step K accumulation.
    B2, D2, O2 = 56, 384, 200
    x2 = jax.random.normal(k_x2, (B2, D2), dtype=jnp.float32)
    w2 = jax.random.normal(k_w2, (O2, D2), dtype=jnp.float32) * 0.05
    out2 = jax.block_until_ready(dist_linear(x2, w2, tm=32, tn=128, tk=128))
    ref2 = dist_linear_ref(x2, w2)
    assert out2.shape == (B2, O2)
    assert jnp.allclose(out2, ref2, atol=1e-4, rtol=1e-4), "mismatch vs reference (tiled)"

    print("KERNEL_OK")
</pallas_src>

<mosaic_0001>
module attributes {stable_mosaic.version = 11 : i64} {
  func.func @_dist_linear_kernel(%arg0: i32, %arg1: i32, %arg2: i32, %arg3: memref<8x128xf32, #tpu.memory_space<vmem>>, %arg4: memref<128x128xf32, #tpu.memory_space<vmem>>, %arg5: memref<8x128xf32, #tpu.memory_space<vmem>>, %arg6: memref<8x128xf32, #tpu.memory_space<vmem>>, %arg7: memref<8x1xf32, #tpu.memory_space<vmem>>, %arg8: memref<8x128xf32, #tpu.memory_space<vmem>>) attributes {dimension_semantics = [#tpu.dimension_semantics<parallel>, #tpu.dimension_semantics<parallel>, #tpu.dimension_semantics<arbitrary>], iteration_bounds = array<i64: 1, 1, 1>, scalar_prefetch = 0 : i64, scratch_operands = 3 : i64, tpu.core_type = #tpu.core_type<tc>, window_params = [{transform_indices = @transform_0, window_bounds = array<i64: 8, 128>}, {transform_indices = @transform_1, window_bounds = array<i64: 128, 128>}, {transform_indices = @transform_2, window_bounds = array<i64: 8, 128>}]} {
    %c0_i32 = arith.constant 0 : i32
    %0 = arith.cmpi eq, %arg2, %c0_i32 : i32
    %1 = arith.extui %0 : i1 to i32
    %c0_i32_0 = arith.constant 0 : i32
    %2 = arith.cmpi ne, %1, %c0_i32_0 : i32
    scf.if %2 {
      %cst_21 = arith.constant 0.000000e+00 : f32
      %24 = vector.broadcast %cst_21 : f32 to vector<8x128xf32>
      %c0_22 = arith.constant 0 : index
      %c0_23 = arith.constant 0 : index
      %25 = vector.load %arg6[%c0_22, %c0_23] : memref<8x128xf32, #tpu.memory_space<vmem>>, vector<8x128xf32>
      tpu.vector_store %arg6[%c0_22, %c0_23], %24 {strides = array<i32>} : memref<8x128xf32, #tpu.memory_space<vmem>>, vector<8x128xf32>,
      %cst_24 = arith.constant 0.000000e+00 : f32
      %26 = vector.broadcast %cst_24 : f32 to vector<8x1xf32>
      %c0_25 = arith.constant 0 : index
      %c0_26 = arith.constant 0 : index
      %27 = vector.load %arg7[%c0_25, %c0_26] : memref<8x1xf32, #tpu.memory_space<vmem>>, vector<8x1xf32>
      tpu.vector_store %arg7[%c0_25, %c0_26], %26 {strides = array<i32>} : memref<8x1xf32, #tpu.memory_space<vmem>>, vector<8x1xf32>,
      %cst_27 = arith.constant 0.000000e+00 : f32
      %28 = vector.broadcast %cst_27 : f32 to vector<8x128xf32>
      %c0_28 = arith.constant 0 : index
      %c0_29 = arith.constant 0 : index
      %29 = vector.load %arg8[%c0_28, %c0_29] : memref<8x128xf32, #tpu.memory_space<vmem>>, vector<8x128xf32>
      tpu.vector_store %arg8[%c0_28, %c0_29], %28 {strides = array<i32>} : memref<8x128xf32, #tpu.memory_space<vmem>>, vector<8x128xf32>,
    } else {
    }
    %c0 = arith.constant 0 : index
    %c0_1 = arith.constant 0 : index
    %3 = vector.load %arg3[%c0, %c0_1] : memref<8x128xf32, #tpu.memory_space<vmem>>, vector<8x128xf32>
    %c0_2 = arith.constant 0 : index
    %c0_3 = arith.constant 0 : index
    %4 = vector.load %arg4[%c0_2, %c0_3] : memref<128x128xf32, #tpu.memory_space<vmem>>, vector<128x128xf32>
    %c0_4 = arith.constant 0 : index
    %c0_5 = arith.constant 0 : index
    %5 = vector.load %arg6[%c0_4, %c0_5] : memref<8x128xf32, #tpu.memory_space<vmem>>, vector<8x128xf32>
    %cst = arith.constant dense<0.000000e+00> : vector<8x128xf32>
    %6 = tpu.matmul %3, %4, %cst {dimension_numbers = #tpu.dot_dimension_numbers<[1], [1], [0], [0], [0, 0, 1, 0], [], []>} : vector<8x128xf32>, vector<128x128xf32>, vector<8x128xf32> -> vector<8x128xf32>
    %7 = arith.addf %5, %6 : vector<8x128xf32>
    %c0_6 = arith.constant 0 : index
    %c0_7 = arith.constant 0 : index
    %8 = vector.load %arg6[%c0_6, %c0_7] : memref<8x128xf32, #tpu.memory_space<vmem>>, vector<8x128xf32>
    tpu.vector_store %arg6[%c0_6, %c0_7], %7 {strides = array<i32>} : memref<8x128xf32, #tpu.memory_space<vmem>>, vector<8x128xf32>,
    %c0_8 = arith.constant 0 : index
    %c0_9 = arith.constant 0 : index
    %9 = vector.load %arg7[%c0_8, %c0_9] : memref<8x1xf32, #tpu.memory_space<vmem>>, vector<8x1xf32>
    %10 = arith.mulf %3, %3 : vector<8x128xf32>
    %cst_10 = arith.constant dense<0.000000e+00> : vector<8xf32>
    %11 = vector.multi_reduction <add>, %10, %cst_10 [1] : vector<8x128xf32> to vector<8xf32>
    %12 = vector.shape_cast %11 : vector<8xf32> to vector<8x1xf32>
    %13 = arith.addf %9, %12 : vector<8x1xf32>
    %c0_11 = arith.constant 0 : index
    %c0_12 = arith.constant 0 : index
    %14 = vector.load %arg7[%c0_11, %c0_12] : memref<8x1xf32, #tpu.memory_space<vmem>>, vector<8x1xf32>
    tpu.vector_store %arg7[%c0_11, %c0_12], %13 {strides = array<i32>} : memref<8x1xf32, #tpu.memory_space<vmem>>, vector<8x1xf32>,
    %cst_13 = arith.constant 1.000000e+00 : f32
    %15 = vector.broadcast %cst_13 : f32 to vector<8x128xf32>
    %c0_14 = arith.constant 0 : index
    %c0_15 = arith.constant 0 : index
    %16 = vector.load %arg8[%c0_14, %c0_15] : memref<8x128xf32, #tpu.memory_space<vmem>>, vector<8x128xf32>
    %17 = arith.mulf %4, %4 : vector<128x128xf32>
    %cst_16 = arith.constant dense<0.000000e+00> : vector<8x128xf32>
    %18 = tpu.matmul %15, %17, %cst_16 {dimension_numbers = #tpu.dot_dimension_numbers<[1], [1], [0], [0], [0, 0, 1, 0], [], []>} : vector<8x128xf32>, vector<128x128xf32>, vector<8x128xf32> -> vector<8x128xf32>
    %19 = arith.addf %16, %18 : vector<8x128xf32>
    %c0_17 = arith.constant 0 : index
    %c0_18 = arith.constant 0 : index
    %20 = vector.load %arg8[%c0_17, %c0_18] : memref<8x128xf32, #tpu.memory_space<vmem>>, vector<8x128xf32>
    tpu.vector_store %arg8[%c0_17, %c0_18], %19 {strides = array<i32>} : memref<8x128xf32, #tpu.memory_space<vmem>>, vector<8x128xf32>,
    %c0_i32_19 = arith.constant 0 : i32
    %21 = arith.cmpi eq, %arg2, %c0_i32_19 : i32
    %22 = arith.extui %21 : i1 to i32
    %c0_i32_20 = arith.constant 0 : i32
    %23 = arith.cmpi ne, %22, %c0_i32_20 : i32
    scf.if %23 {
      %c0_21 = arith.constant 0 : index
      %c0_22 = arith.constant 0 : index
      %24 = vector.load %arg7[%c0_21, %c0_22] : memref<8x1xf32, #tpu.memory_space<vmem>>, vector<8x1xf32>
      %25 = math.sqrt %24 : vector<8x1xf32>
      %cst_23 = arith.constant 9.99999974E-6 : f32
      %26 = vector.broadcast %cst_23 : f32 to vector<8x1xf32>
      %27 = arith.addf %25, %26 : vector<8x1xf32>
      %28 = tpu.reciprocal %27 : vector<8x1xf32> -> vector<8x1xf32>
      %c0_24 = arith.constant 0 : index
      %c0_25 = arith.constant 0 : index
      %29 = vector.load %arg8[%c0_24, %c0_25] : memref<8x128xf32, #tpu.memory_space<vmem>>, vector<8x128xf32>
      %30 = vector.extract_strided_slice %29 {offsets = [0, 0], sizes = [1, 128], strides = [1, 1]} : vector<8x128xf32> to vector<1x128xf32>
      %31 = math.sqrt %30 : vector<1x128xf32>
      %cst_26 = arith.constant 9.99999974E-6 : f32
      %32 = vector.broadcast %cst_26 : f32 to vector<1x128xf32>
      %33 = arith.addf %31, %32 : vector<1x128xf32>
      %34 = tpu.reciprocal %33 : vector<1x128xf32> -> vector<1x128xf32>
      %c0_27 = arith.constant 0 : index
      %c0_28 = arith.constant 0 : index
      %35 = vector.load %arg6[%c0_27, %c0_28] : memref<8x128xf32, #tpu.memory_space<vmem>>, vector<8x128xf32>
      %cst_29 = arith.constant 1.000000e+01 : f32
      %36 = vector.broadcast %cst_29 : f32 to vector<8x128xf32>
      %37 = arith.mulf %36, %35 : vector<8x128xf32>
      %38 = vector.broadcast %28 : vector<8x1xf32> to vector<8x128xf32>
      %39 = arith.mulf %37, %38 : vector<8x128xf32>
      %40 = vector.broadcast %34 : vector<1x128xf32> to vector<8x128xf32>
      %41 = arith.mulf %39, %40 : vector<8x128xf32>
      %c0_30 = arith.constant 0 : index
      %c0_31 = arith.constant 0 : index
      %42 = vector.load %arg5[%c0_30, %c0_31] : memref<8x128xf32, #tpu.memory_space<vmem>>, vector<8x128xf32>
      tpu.vector_store %arg5[%c0_30, %c0_31], %41 {strides = array<i32>} : memref<8x128xf32, #tpu.memory_space<vmem>>, vector<8x128xf32>,
    } else {
    }
    return
  }
  func.func @transform_0(%arg0: i32, %arg1: i32, %arg2: i32) -> (i32, i32) {
    %c0_i32 = arith.constant 0 : i32
    return %arg0, %arg2 : i32, i32
  }
  func.func @transform_1(%arg0: i32, %arg1: i32, %arg2: i32) -> (i32, i32) {
    %c0_i32 = arith.constant 0 : i32
    return %arg1, %arg2 : i32, i32
  }
  func.func @transform_2(%arg0: i32, %arg1: i32, %arg2: i32) -> (i32, i32) {
    %c0_i32 = arith.constant 0 : i32
    return %arg0, %arg1 : i32, i32
  }
}

</mosaic_0001>

<bundles_post_ra>
// kernel: tpu_custom_call.1
= control target key start
LH: loop header
LB: loop body
LE: loop exit
PB: predicated region body
PF: predicated region fallthrough
CT: control target
= control target key end

     0   :  { %7 = vsyncpa [#allocation6], 0  ;;  %s548_s0 = inlined_call_operand.hbm [shape: f32[8,128], index: 0, kind: input, shape index: {}]   ;;  %s549_s1 = inlined_call_operand.hbm [shape: f32[128,128], index: 1, kind: input, shape index: {}]   ;;  %s550_s2 = inlined_call_operand.hbm [shape: f32[8,128], index: 2, kind: output, shape index: {}]  }
   0x1   :  { %8 = vsyncpa [#allocation9], 0 }
   0x2   :  { %9 = vsyncpa [#allocation7], 0  ;;  %s473_s9 = smov [#allocation5]   ;;  %s474_s11 = smov [#allocation8]  }
   0x3   :  { %s16_s10 = sshll.u32 %s473_s9, 4  ;;  %s25_s12 = sshll.u32 %s474_s11, 4  ;;  %s17_s10 = int_to_ptr.vmem [resolvable:$true] %s16_s10  ;;  %s26_s12 = int_to_ptr.vmem [resolvable:$true] %s25_s12 }
   0x4   :  { %s415_s13 = scalar_lea.vmem %s17_s10, 128  ;;  %p420_p1 = scmp.lt.s32.totalorder %s17_s10, %s17_s10 }
   0x5   :  { %p416_p0 = scmp.ne.s32.totalorder %s17_s10, %s415_s13  ;;  %p421_p2 = scmp.lt.s32.totalorder %s415_s13, %s415_s13 }
   0x7   :  { %p422_p3 = por %p421_p2, %p420_p1 }
   0x9   :  { %p423_p4 = pnand %p422_p3, %p416_p0 }
   0xb   :  { %426 = shalt.err (!%p423_p4)
}
   0xc   :  { %19 = dma.hbm_to_vmem [thread:$0]  %s548_s0, 128, %s17_s10, [#allocation6]  }
   0xd   :  { %s435_s16 = scalar_lea.vmem %s26_s12, 2048  ;;  %p440_p6 = scmp.lt.s32.totalorder %s26_s12, %s26_s12 }
   0xe   :  { %p436_p5 = scmp.ne.s32.totalorder %s26_s12, %s435_s16  ;;  %p441_p7 = scmp.lt.s32.totalorder %s435_s16, %s435_s16 }
  0x10   :  { %p442_p8 = por %p441_p7, %p440_p6 }
  0x12   :  { %p443_p9 = pnand %p442_p8, %p436_p5 }
  0x14   :  { %446 = shalt.err (!%p443_p9)
}
  0x15   :  { %s475_s17 = smov 128   ;;  %s476_s18 = smov 8  }
  0x16   :  { %31 = dma.hbm_to_vmem [thread:$0]  %s549_s1, 2048, %s26_s12, [#allocation9], %s475_s17, %s475_s17, %s476_s18  }
  0x17   :  { %467 = dma.done.wait [#allocation6], 128  }
  0x18   :  { %468 = vsyncadd [#allocation6], 4294967168 }
  0x19   :  { %469 = dma.done.wait [#allocation9], 2048  }
  0x1a   :  { %470 = vsyncadd [#allocation9], 4294965248  ;;  %vm43_vm0 = vcmask 7168   ;;  %v477_v0 = vmov 0.0   ;;  %vm478_vm1 = vmmov 0   ;;  %v62_v1 = vld [vmem:[#allocation8 + $0x78] sm:$0xff]  ;;  %v263_v58 = vlaneseq }
  0x1b   :  { %354 = vmatprep.subr.mxu1 %v477_v0  ;;  %319 = vmatprep.subr.mxu0 %v477_v0  ;;  %44 = vst.msk [vmem:[#allocation3] sm:$0xff] %vm43_vm0, %v477_v0  ;;  %v509_v2 = vld [vmem:[#allocation5] sm:$0xff]  ;;  %v61_v3 = vld [vmem:[#allocation8 + $0x70] sm:$0xff]  ;;  %v159_v4 = vmul.f32 %v62_v1, %v62_v1  ;;  %v60_v7 = vld [vmem:[#allocation8 + $0x68] sm:$0xff]  ;;  %v479_v18 = vmov 0   ;;  %v480_v36 = vmov 1.0  }
  0x1c   :  { %386 = vmatprep.mubr.msk.f32.mxu1 %vm478_vm1, %v477_v0  ;;  %351 = vmatprep.mubr.msk.f32.mxu0 %vm478_vm1, %v477_v0  ;;  %v137_v5 = vmul.f32 %v509_v2, %v509_v2  ;;  %v158_v6 = vmul.f32 %v61_v3, %v61_v3  ;;  %v157_v8 = vmul.f32 %v60_v7, %v60_v7  ;;  %v59_v9 = vld [vmem:[#allocation8 + $0x60] sm:$0xff]  ;;  %v58_v11 = vld [vmem:[#allocation8 + $0x58] sm:$0xff]  ;;  %v57_v13 = vld [vmem:[#allocation8 + $0x50] sm:$0xff]  ;;  %v264_v59 = vshrl.u32 %v263_v58, 7  ;;  %s481_s0 = smov [#allocation10]  }
  0x1d   :  { %320 = vmatpush3.xpose.msra.mxu0 %v62_v1  ;;  %355 = vmatpush3.xpose.msra.mxu1 %v159_v4  ;;  %v156_v10 = vmul.f32 %v59_v9, %v59_v9  ;;  %v155_v12 = vmul.f32 %v58_v11, %v58_v11  ;;  %v154_v14 = vmul.f32 %v57_v13, %v57_v13  ;;  %v56_v15 = vld [vmem:[#allocation8 + $0x48] sm:$0xff]  ;;  %v55_v17 = vld [vmem:[#allocation8 + $0x40] sm:$0xff]  ;;  %v54_v20 = vld [vmem:[#allocation8 + $0x38] sm:$0xff]  ;;  %s275_s1 = sshll.u32 %s481_s0, 4  ;;  %s276_s1 = int_to_ptr.vmem [resolvable:$true] %s275_s1 }
  0x1e   :  { %321 = vmatprep.subr.mxu0 %v477_v0  ;;  %138 = vadd.xlane.f32.xlu0 %v137_v5  ;;  %v153_v16 = vmul.f32 %v56_v15, %v56_v15  ;;  %v152_v19 = vmul.f32 %v55_v17, %v55_v17  ;;  %v151_v21 = vmul.f32 %v54_v20, %v54_v20  ;;  %v53_v22 = vld [vmem:[#allocation8 + $0x30] sm:$0xff]  ;;  %v52_v24 = vld [vmem:[#allocation8 + $0x28] sm:$0xff]  ;;  %v51_v26 = vld [vmem:[#allocation8 + $0x20] sm:$0xff]  ;;  %v265_v61 = vsub.s32 0, %v264_v59  ;;  %s447_s21 = scalar_lea.vmem %s276_s1, 128  ;;  %p452_p11 = scmp.lt.s32.totalorder %s276_s1, %s276_s1 }
  0x1f   :  { %356 = vmatprep.subr.mxu1 %v477_v0  ;;  %398 = vset.pattern.permute.xlu0 %v479_v18  ;;  %v150_v23 = vmul.f32 %v53_v22, %v53_v22  ;;  %v149_v25 = vmul.f32 %v52_v24, %v52_v24  ;;  %v148_v27 = vmul.f32 %v51_v26, %v51_v26  ;;  %v50_v28 = vld [vmem:[#allocation8 + $0x18] sm:$0xff]  ;;  %v49_v30 = vld [vmem:[#allocation8 + $0x10] sm:$0xff]  ;;  %v48_v32 = vld [vmem:[#allocation8 + $0x8] sm:$0xff]  ;;  %p448_p10 = scmp.ne.s32.totalorder %s276_s1, %s447_s21  ;;  %p453_p12 = scmp.lt.s32.totalorder %s447_s21, %s447_s21 }
  0x20   :  { %v147_v29 = vmul.f32 %v50_v28, %v50_v28  ;;  %v146_v31 = vmul.f32 %v49_v30, %v49_v30  ;;  %v145_v33 = vmul.f32 %v48_v32, %v48_v32  ;;  %v47_v34 = vld [vmem:[#allocation8] sm:$0xff] }
  0x21   :  { %322 = vmatpush3.xpose.msra.mxu0 %v61_v3  ;;  %357 = vmatpush3.xpose.msra.mxu1 %v158_v6  ;;  %v144_v35 = vmul.f32 %v47_v34, %v47_v34  ;;  %p454_p13 = por %p453_p12, %p452_p11 }
  0x22   :  { %323 = vmatprep.subr.mxu0 %v477_v0  ;;  %358 = vmatprep.subr.mxu1 %v477_v0  ;;  %v136_v37 = vld [vmem:[#allocation3] sm:$0xff] }
  0x23   :  { %p455_p0 = pnand %p454_p13, %p448_p10 }
  0x25   :  { %324 = vmatpush3.xpose.msra.mxu0 %v60_v7  ;;  %359 = vmatpush3.xpose.msra.mxu1 %v157_v8 }
  0x26   :  { %325 = vmatprep.subr.mxu0 %v477_v0  ;;  %360 = vmatprep.subr.mxu1 %v477_v0 }
  0x29   :  { %326 = vmatpush3.xpose.msra.mxu0 %v59_v9  ;;  %361 = vmatpush3.xpose.msra.mxu1 %v156_v10 }
  0x2a   :  { %327 = vmatprep.subr.mxu0 %v477_v0  ;;  %362 = vmatprep.subr.mxu1 %v477_v0 }
  0x2d   :  { %328 = vmatpush3.xpose.msra.mxu0 %v58_v11  ;;  %363 = vmatpush3.xpose.msra.mxu1 %v155_v12 }
  0x2e   :  { %329 = vmatprep.subr.mxu0 %v477_v0  ;;  %364 = vmatprep.subr.mxu1 %v477_v0 }
  0x31   :  { %330 = vmatpush3.xpose.msra.mxu0 %v57_v13  ;;  %365 = vmatpush3.xpose.msra.mxu1 %v154_v14 }
  0x32   :  { %331 = vmatprep.subr.mxu0 %v477_v0  ;;  %366 = vmatprep.subr.mxu1 %v477_v0 }
  0x35   :  { %332 = vmatpush3.xpose.msra.mxu0 %v56_v15  ;;  %367 = vmatpush3.xpose.msra.mxu1 %v153_v16 }
  0x36   :  { %333 = vmatprep.subr.mxu0 %v477_v0  ;;  %368 = vmatprep.subr.mxu1 %v477_v0 }
  0x39   :  { %334 = vmatpush3.xpose.msra.mxu0 %v55_v17  ;;  %369 = vmatpush3.xpose.msra.mxu1 %v152_v19 }
  0x3a   :  { %335 = vmatprep.subr.mxu0 %v477_v0  ;;  %370 = vmatprep.subr.mxu1 %v477_v0 }
  0x3d   :  { %336 = vmatpush3.xpose.msra.mxu0 %v54_v20  ;;  %371 = vmatpush3.xpose.msra.mxu1 %v151_v21 }
  0x3e   :  { %337 = vmatprep.subr.mxu0 %v477_v0  ;;  %372 = vmatprep.subr.mxu1 %v477_v0 }
  0x41   :  { %338 = vmatpush3.xpose.msra.mxu0 %v53_v22  ;;  %373 = vmatpush3.xpose.msra.mxu1 %v150_v23 }
  0x42   :  { %339 = vmatprep.subr.mxu0 %v477_v0  ;;  %374 = vmatprep.subr.mxu1 %v477_v0 }
  0x45   :  { %340 = vmatpush3.xpose.msra.mxu0 %v52_v24  ;;  %375 = vmatpush3.xpose.msra.mxu1 %v149_v25 }
  0x46   :  { %341 = vmatprep.subr.mxu0 %v477_v0  ;;  %376 = vmatprep.subr.mxu1 %v477_v0 }
  0x49   :  { %342 = vmatpush3.xpose.msra.mxu0 %v51_v26  ;;  %377 = vmatpush3.xpose.msra.mxu1 %v148_v27 }
  0x4a   :  { %343 = vmatprep.subr.mxu0 %v477_v0  ;;  %378 = vmatprep.subr.mxu1 %v477_v0 }
  0x4d   :  { %344 = vmatpush3.xpose.msra.mxu0 %v50_v28  ;;  %379 = vmatpush3.xpose.msra.mxu1 %v147_v29 }
  0x4e   :  { %345 = vmatprep.subr.mxu0 %v477_v0  ;;  %380 = vmatprep.subr.mxu1 %v477_v0 }
  0x51   :  { %346 = vmatpush3.xpose.msra.mxu0 %v49_v30  ;;  %381 = vmatpush3.xpose.msra.mxu1 %v146_v31 }
  0x52   :  { %347 = vmatprep.subr.mxu0 %v477_v0  ;;  %382 = vmatprep.subr.mxu1 %v477_v0 }
  0x55   :  { %348 = vmatpush3.xpose.msra.mxu0 %v48_v32  ;;  %383 = vmatpush3.xpose.msra.mxu1 %v145_v33 }
  0x56   :  { %349 = vmatprep.subr.mxu0 %v477_v0  ;;  %384 = vmatprep.subr.mxu1 %v477_v0 }
  0x59   :  { %350 = vmatpush3.xpose.msra.mxu0 %v47_v34  ;;  %385 = vmatpush3.xpose.msra.mxu1 %v144_v35 }
  0x5c   :  { %352 = vmatmul.mubr.f32.vlgmr.msra.gmra.mxu0 %v509_v2  ;;  %387 = vmatmul.mubr.f32.vlgmr.msra.gmra.mxu1 %v480_v36 }
  0xa7   :  { %v139_v38 = vpop.xlane.xlu0 %138 }
  0xa8   :  { %v140_v39 = vadd.f32 %v139_v38, %v136_v37 }
  0xaa   :  { %142 = vst.msk [vmem:[#allocation3] sm:$0xff] %vm43_vm0, %v140_v39 }
  0xb1   :  { %v235_v40 = vld [vmem:[#allocation3] sm:$0xff] }
  0xb2   :  { %399 = vrsqrt.f32 %v235_v40  ;;  %vm238_vm2 = vcmp.eq.f32.partialorder %v235_v40, inf  ;;  %v241_v43 = vand.u32 2147483648, %v235_v40  ;;  %vm240_vm3 = vcmp.eq.f32.partialorder %v235_v40, 0.0 }
  0xbf   :  { %v400_v41 = vpop.eup %399 }
  0xc0   :  { %v237_v42 = vmul.f32 %v400_v41, %v235_v40 }
  0xc2   :  { %v239_v44 = vsel %vm238_vm2, %v235_v40, %v237_v42 }
  0xc3   :  { %v242_v45 = vsel %vm240_vm3, %v241_v43, %v239_v44 }
  0xc4   :  { %v243_v46 = vadd.f32 1e-05, %v242_v45 }
  0xc6   :  { %401 = vrcp.f32 %v243_v46 }
  0xd3   :  { %v402_v47 = vpop.eup %401 }
  0xd4   :  { %259 = vperm.xlu0 %398, %v402_v47  }
 0x11c   :  { %v130_v48 = vpop.f32.mrf.mxu0  ;;  %v226_v49 = vpop.f32.mrf.mxu1 }
 0x11d   :  { %403 = vrsqrt.f32 %v226_v49  ;;  %vm248_vm4 = vcmp.eq.f32.partialorder %v226_v49, inf  ;;  %v251_v54 = vand.u32 2147483648, %v226_v49  ;;  %vm250_vm5 = vcmp.eq.f32.partialorder %v226_v49, 0.0 }
 0x11e   :  { %v353_v50 = vpop.f32.mrf.mxu0  ;;  %v388_v51 = vpop.f32.mrf.mxu1  ;;  %v256_v60 = vmul.f32 10.0, %v130_v48 }
 0x12a   :  { %v404_v52 = vpop.eup %403 }
 0x12b   :  { %v247_v53 = vmul.f32 %v404_v52, %v226_v49 }
 0x12d   :  { %v249_v55 = vsel %vm248_vm4, %v226_v49, %v247_v53 }
 0x12e   :  { %v252_v56 = vsel %vm250_vm5, %v251_v54, %v249_v55 }
 0x12f   :  { %v253_v57 = vadd.f32 1e-05, %v252_v56 }
 0x131   :  { %405 = vrcp.f32 %v253_v57 }
 0x13e   :  { %v406_v62 = vpop.eup %405 }
 0x13f   :  { %v266_v0 = vrot.slane %v406_v62, %v265_v61 }
 0x14f   :  { %v260_v63 = vpop.permute.xlu0 %259 }
 0x150   :  { %v262_v1 = vmul.f32 %v260_v63, %v256_v60 }
 0x152   :  { %v267_v2 = vmul.f32 %v266_v0, %v262_v1 }
 0x154   :  { %268 = vst [vmem:[#allocation10] sm:$0xff] %v267_v2 }
 0x155   :  { %458 = shalt.err (!%p455_p0)
}
 0x156   :  { %278 = dma.vmem_to_hbm [thread:$0]  %s276_s1, 128, %s550_s2, [#allocation7]  }
 0x157   :  { %471 = dma.done.wait [#allocation7], 128  }
 0x158   :  { %472 = vsyncadd [#allocation7], 4294967168 }
 0x159   :  { %282 = vsyncpa [#allocation6], 1 }
 0x15a   :  { %283 = vsyncpa [#allocation9], 1 }
 0x15b   :  { %284 = vsyncpa [#allocation7], 1 }

</bundles_post_ra>
